<compile_context>
chip_gen: v7x
topology: tpu7x:2x2x1
jax: 0.10.0
libtpu: 0.0.40
codegen_flags: <defaults>
</compile_context>

<pallas_src>
import jax
import jax.numpy as jnp
from jax import lax
from jax.experimental import pallas as pl
from jax.experimental.pallas import tpu as pltpu

# ----------------------------- configuration ------------------------------
B = 2              # batch
S = 8              # sequence length
H = 32             # hidden size
V = 64             # vocab size
N_TYPES = 2        # token type vocab
N_CLASSES = 3      # main classifier classes
N_PARA = 2         # additional (paraphrase) classifier classes
N_HEADS = N_CLASSES + N_PARA     # merged [cls | para] head width

TWO_B = 2 * B                    # both directions stacked
TWO_BS = TWO_B * S               # flattened token rows
FEAT = V + N_TYPES + 1           # [onehot_tok | onehot_typ | mask] lane width

# Packed parameter slab: one (PARAM_ROWS, H) f32 array, row offsets 8-aligned.
EMB_ROWS = V + N_TYPES                       # rows 0:66   -> [tok_emb; type_emb]
WP_R0 = ((EMB_ROWS + 7) // 8) * 8            # 72          -> w_pool   (H, H)
WH_R0 = WP_R0 + H                            # 104         -> w_heads  (H, NH)
WS_R0 = WH_R0 + H                            # 136         -> w_siam   (3H, NH)
B_R0 = WS_R0 + 3 * H                         # 232         -> biases (3 rows)
PARAM_ROWS = ((B_R0 + 3 + 7) // 8) * 8       # 240

# Packed, lane-dense output slab (one (8, 128) f32 vreg tile).
OUT_ROWS = 8
OUT_COLS = 128
assert TWO_B + B <= OUT_ROWS
assert H + N_HEADS <= OUT_COLS


# --------------------------- fused Pallas kernel ---------------------------
def dual_model_kernel(tok_ref, p_ref, out_ref):
    """Fused DualModel forward for both directions.

    tok_ref : (2B*S, 3) int32 — columns [input_ids, token_type_ids, mask],
              rows ordered (direction, batch, seq)-major.
    p_ref   : (PARAM_ROWS, H) f32 packed parameter slab (see offsets above).
    out_ref : (8, 128) f32 packed output slab.
    """
    f32 = jnp.float32

    ids = tok_ref[:, 0:1]                                           # (2BS, 1)
    tts = tok_ref[:, 1:2]
    m = tok_ref[:, 2:3].astype(f32)

    # --- embedding lookup + masked mean pool as bag-of-words matmuls (MXU) ---
    tok_iota = lax.broadcasted_iota(jnp.int32, (TWO_BS, V), 1)
    typ_iota = lax.broadcasted_iota(jnp.int32, (TWO_BS, N_TYPES), 1)
    onehot_tok = (ids == tok_iota).astype(f32) * m                  # (2BS, V)
    onehot_typ = (tts == typ_iota).astype(f32) * m                  # (2BS, T)
    # Lane-concat one-hots + mask column: ONE sel@feat push yields token bow,
    # type bow, and the valid-token count in a single result.
    feat = jnp.concatenate([onehot_tok, onehot_typ, m], axis=1)     # (2BS, FEAT)

    # Per-example selector: sel[b2, j] = 1 iff flattened token j belongs to
    # stacked example b2 (rows b2*S .. b2*S+S-1).  Built from iotas.
    row = lax.broadcasted_iota(jnp.int32, (TWO_B, TWO_BS), 0)
    col = lax.broadcasted_iota(jnp.int32, (TWO_B, TWO_BS), 1)
    lo = row * S
    sel = ((col >= lo) & (col < lo + S)).astype(f32)                # (2B, 2BS)

    bow = jnp.dot(sel, feat, preferred_element_type=f32)            # (2B, FEAT)
    emb = p_ref[0:EMB_ROWS, :]                                      # (V+T, H)
    summed = jnp.dot(bow[:, 0:EMB_ROWS], emb,
                     preferred_element_type=f32)                    # (2B, H)
    count = bow[:, EMB_ROWS:EMB_ROWS + 1]                           # (2B, 1)
    pooled = summed / jnp.maximum(count, 1.0)                       # exact divide

    # --- pooler + merged [classifier | paraphrase] head ---
    wp = p_ref[WP_R0:WP_R0 + H, 0:H]
    bp = p_ref[B_R0:B_R0 + 1, 0:H]
    h = jnp.tanh(jnp.dot(pooled, wp, preferred_element_type=f32) + bp)   # (2B, H)

    wh = p_ref[WH_R0:WH_R0 + H, 0:N_HEADS]
    bh = p_ref[B_R0 + 1:B_R0 + 2, 0:N_HEADS]
    enc_logits = jnp.dot(h, wh, preferred_element_type=f32) + bh         # (2B, NH)

    # --- siamese head on [h0 | h1 | |h0-h1|] as ONE (B, 3H) x (3H, NH) push ---
    h0 = h[0:B, :]
    h1 = h[B:TWO_B, :]
    h_cat = jnp.concatenate([h0, h1, jnp.abs(h0 - h1)], axis=1)          # (B, 3H)
    ws = p_ref[WS_R0:WS_R0 + 3 * H, 0:N_HEADS]
    bs = p_ref[B_R0 + 2:B_R0 + 3, 0:N_HEADS]
    siam_logits = jnp.dot(h_cat, ws, preferred_element_type=f32) + bs    # (B, NH)

    # --- assemble packed (8, 128) slab in-register, ONE unmasked store ---
    top = jnp.concatenate(
        [h, enc_logits, jnp.zeros((TWO_B, OUT_COLS - H - N_HEADS), f32)], axis=1)
    mid = jnp.concatenate(
        [siam_logits, jnp.zeros((B, OUT_COLS - N_HEADS), f32)], axis=1)
    bot = jnp.zeros((OUT_ROWS - TWO_B - B, OUT_COLS), f32)
    out_ref[...] = jnp.concatenate([top, mid, bot], axis=0)


# ------------------------------ wrappers -----------------------------------
_VMEM = pl.BlockSpec(memory_space=pltpu.MemorySpace.VMEM)


def _fused_forward(tok, p_slab):
    return pl.pallas_call(
        dual_model_kernel,
        out_shape=jax.ShapeDtypeStruct((OUT_ROWS, OUT_COLS), jnp.float32),
        in_specs=[_VMEM, _VMEM],
        out_specs=_VMEM,
    )(tok, p_slab)


def dual_model_forward(lr_input_ids, lr_attention_mask,
                       rl_input_ids, rl_attention_mask,
                       p_slab,
                       lr_token_type_ids=None, rl_token_type_ids=None):
    if lr_token_type_ids is None:
        lr_token_type_ids = jnp.zeros_like(lr_input_ids)
    if rl_token_type_ids is None:
        rl_token_type_ids = jnp.zeros_like(rl_input_ids)

    # Stack both directions (rows [0:B] = lr, [B:2B] = rl), flatten to token
    # rows and pack ids/type/mask into ONE int32 slab -> a single input DMA.
    ids = jnp.concatenate([lr_input_ids, rl_input_ids], axis=0).reshape(TWO_BS)
    tts = jnp.concatenate([lr_token_type_ids, rl_token_type_ids],
                          axis=0).reshape(TWO_BS)
    msk = jnp.concatenate([lr_attention_mask, rl_attention_mask],
                          axis=0).reshape(TWO_BS)
    tok = jnp.stack([ids, tts, msk], axis=-1).astype(jnp.int32)      # (2BS, 3)

    out = _fused_forward(tok, p_slab)

    # Unpack the (8, 128) slab (cheap XLA slices / reshapes).
    hidden_last = out[0:TWO_B, 0:H].reshape(2, B, H)                 # (2, B, H)
    enc = out[0:TWO_B, H:H + N_HEADS].reshape(2, B, N_HEADS)         # (2, B, NH)
    siam = out[TWO_B:TWO_B + B, 0:N_HEADS][None]                     # (1, B, NH)

    logits = jnp.concatenate([enc[..., :N_CLASSES], siam[..., :N_CLASSES]], axis=0)
    logits_para = jnp.concatenate([enc[..., N_CLASSES:], siam[..., N_CLASSES:]], axis=0)
    return logits, hidden_last, logits_para


# --------------------------- parameter init --------------------------------
def init_params(key):
    ks = jax.random.split(key, 5)
    scale = 0.02
    return {
        "tok_emb": (scale * jax.random.normal(ks[0], (V, H))).astype(jnp.float32),
        "type_emb": (scale * jax.random.normal(ks[1], (N_TYPES, H))).astype(jnp.float32),
        "w_pool": (scale * jax.random.normal(ks[2], (H, H))).astype(jnp.float32),
        "b_pool": jnp.zeros((H,), jnp.float32),
        # Main classifier (cols 0:N_CLASSES) and paraphrase head (cols N_CLASSES:)
        # merged along out_features.
        "w_heads": (scale * jax.random.normal(ks[3], (H, N_HEADS))).astype(jnp.float32),
        "b_heads": jnp.zeros((N_HEADS,), jnp.float32),
        "w_siam_heads": (scale * jax.random.normal(ks[4], (3 * H, N_HEADS))).astype(jnp.float32),
        "b_siam_heads": jnp.zeros((N_HEADS,), jnp.float32),
    }


def pack_params(p):
    """Pack every parameter into one (PARAM_ROWS, H) f32 slab (one DMA)."""
    slab = jnp.zeros((PARAM_ROWS, H), jnp.float32)
    slab = slab.at[0:V, :].set(p["tok_emb"])
    slab = slab.at[V:V + N_TYPES, :].set(p["type_emb"])
    slab = slab.at[WP_R0:WP_R0 + H, 0:H].set(p["w_pool"])
    slab = slab.at[WH_R0:WH_R0 + H, 0:N_HEADS].set(p["w_heads"])
    slab = slab.at[WS_R0:WS_R0 + 3 * H, 0:N_HEADS].set(p["w_siam_heads"])
    slab = slab.at[B_R0, 0:H].set(p["b_pool"])
    slab = slab.at[B_R0 + 1, 0:N_HEADS].set(p["b_heads"])
    slab = slab.at[B_R0 + 2, 0:N_HEADS].set(p["b_siam_heads"])
    return slab


if __name__ == "__main__":
    key = jax.random.PRNGKey(0)
    kp, k0, k1 = jax.random.split(key, 3)
    params = init_params(kp)
    p_slab = pack_params(params)

    lr_input_ids = jax.random.randint(k0, (B, S), 0, V, dtype=jnp.int32)
    rl_input_ids = jax.random.randint(k1, (B, S), 0, V, dtype=jnp.int32)
    # mask out the last two positions of each sequence
    base_mask = jnp.concatenate(
        [jnp.ones((B, S - 2), jnp.int32), jnp.zeros((B, 2), jnp.int32)], axis=1)
    lr_attention_mask = base_mask
    rl_attention_mask = base_mask
    lr_token_type_ids = jnp.zeros((B, S), jnp.int32)
    rl_token_type_ids = jnp.ones((B, S), jnp.int32)

    fwd = jax.jit(dual_model_forward)
    logits, hidden_last, logits_para = fwd(
        lr_input_ids, lr_attention_mask, rl_input_ids, rl_attention_mask,
        p_slab,
        lr_token_type_ids=lr_token_type_ids,
        rl_token_type_ids=rl_token_type_ids,
    )
    jax.block_until_ready((logits, hidden_last, logits_para))

    assert logits.shape == (3, B, N_CLASSES)
    assert hidden_last.shape == (2, B, H)
    assert logits_para.shape == (3, B, N_PARA)
    print("KERNEL_OK")
</pallas_src>

<mosaic_0001>
module attributes {stable_mosaic.version = 11 : i64} {
  func.func @dual_model_kernel(%arg0: memref<32x3xi32, #tpu.memory_space<vmem>>, %arg1: memref<240x32xf32, #tpu.memory_space<vmem>>, %arg2: memref<8x128xf32, #tpu.memory_space<vmem>>) attributes {dimension_semantics = [], scalar_prefetch = 0 : i64, scratch_operands = 0 : i64, tpu.core_type = #tpu.core_type<tc>} {
    %c0 = arith.constant 0 : index
    %c0_0 = arith.constant 0 : index
    %0 = vector.load %arg0[%c0, %c0_0] : memref<32x3xi32, #tpu.memory_space<vmem>>, vector<32x1xi32>
    %c0_1 = arith.constant 0 : index
    %c1 = arith.constant 1 : index
    %1 = vector.load %arg0[%c0_1, %c1] : memref<32x3xi32, #tpu.memory_space<vmem>>, vector<32x1xi32>
    %c0_2 = arith.constant 0 : index
    %c2 = arith.constant 2 : index
    %2 = vector.load %arg0[%c0_2, %c2] : memref<32x3xi32, #tpu.memory_space<vmem>>, vector<32x1xi32>
    %3 = arith.sitofp %2 : vector<32x1xi32> to vector<32x1xf32>
    %4 = tpu.iota {dimensions = array<i32: 1>} : vector<32x64xi32>
    %5 = tpu.iota {dimensions = array<i32: 1>} : vector<32x2xi32>
    %6 = vector.broadcast %0 : vector<32x1xi32> to vector<32x64xi32>
    %7 = arith.cmpi eq, %6, %4 : vector<32x64xi32>
    %8 = arith.extui %7 : vector<32x64xi1> to vector<32x64xi32>
    %9 = arith.sitofp %8 : vector<32x64xi32> to vector<32x64xf32>
    %10 = vector.broadcast %3 : vector<32x1xf32> to vector<32x64xf32>
    %11 = arith.mulf %9, %10 : vector<32x64xf32>
    %12 = vector.broadcast %1 : vector<32x1xi32> to vector<32x2xi32>
    %13 = arith.cmpi eq, %12, %5 : vector<32x2xi32>
    %14 = arith.extui %13 : vector<32x2xi1> to vector<32x2xi32>
    %15 = arith.sitofp %14 : vector<32x2xi32> to vector<32x2xf32>
    %16 = vector.broadcast %3 : vector<32x1xf32> to vector<32x2xf32>
    %17 = arith.mulf %15, %16 : vector<32x2xf32>
    %18 = tpu.concatenate %11, %17, %3 in 1 : vector<32x64xf32>, vector<32x2xf32>, vector<32x1xf32> -> vector<32x67xf32>
    %19 = tpu.iota {dimensions = array<i32: 0>} : vector<4x32xi32>
    %20 = tpu.iota {dimensions = array<i32: 1>} : vector<4x32xi32>
    %c8_i32 = arith.constant 8 : i32
    %21 = vector.broadcast %c8_i32 : i32 to vector<4x32xi32>
    %22 = arith.muli %19, %21 : vector<4x32xi32>
    %23 = arith.cmpi sge, %20, %22 : vector<4x32xi32>
    %c8_i32_3 = arith.constant 8 : i32
    %24 = vector.broadcast %c8_i32_3 : i32 to vector<4x32xi32>
    %25 = arith.addi %22, %24 : vector<4x32xi32>
    %26 = arith.cmpi slt, %20, %25 : vector<4x32xi32>
    %27 = arith.andi %23, %26 : vector<4x32xi1>
    %28 = arith.extui %27 : vector<4x32xi1> to vector<4x32xi32>
    %29 = arith.sitofp %28 : vector<4x32xi32> to vector<4x32xf32>
    %cst = arith.constant dense<0.000000e+00> : vector<4x67xf32>
    %30 = tpu.matmul %29, %18, %cst {dimension_numbers = #tpu.dot_dimension_numbers<[1], [0], [0], [1], [0, 0, 1, 1], [], []>} : vector<4x32xf32>, vector<32x67xf32>, vector<4x67xf32> -> vector<4x67xf32>
    %c0_4 = arith.constant 0 : index
    %c0_5 = arith.constant 0 : index
    %31 = vector.load %arg1[%c0_4, %c0_5] : memref<240x32xf32, #tpu.memory_space<vmem>>, vector<66x32xf32>
    %32 = vector.extract_strided_slice %30 {offsets = [0, 0], sizes = [4, 66], strides = [1, 1]} : vector<4x67xf32> to vector<4x66xf32>
    %cst_6 = arith.constant dense<0.000000e+00> : vector<4x32xf32>
    %33 = tpu.matmul %32, %31, %cst_6 {dimension_numbers = #tpu.dot_dimension_numbers<[1], [0], [0], [1], [0, 0, 1, 1], [], []>} : vector<4x66xf32>, vector<66x32xf32>, vector<4x32xf32> -> vector<4x32xf32>
    %34 = vector.extract_strided_slice %30 {offsets = [0, 66], sizes = [4, 1], strides = [1, 1]} : vector<4x67xf32> to vector<4x1xf32>
    %cst_7 = arith.constant 1.000000e+00 : f32
    %35 = vector.broadcast %cst_7 : f32 to vector<4x1xf32>
    %36 = arith.maximumf %34, %35 : vector<4x1xf32>
    %37 = vector.broadcast %36 : vector<4x1xf32> to vector<4x32xf32>
    %38 = arith.divf %33, %37 : vector<4x32xf32>
    %c72 = arith.constant 72 : index
    %c0_8 = arith.constant 0 : index
    %39 = vector.load %arg1[%c72, %c0_8] : memref<240x32xf32, #tpu.memory_space<vmem>>, vector<32x32xf32>
    %c232 = arith.constant 232 : index
    %c0_9 = arith.constant 0 : index
    %40 = vector.load %arg1[%c232, %c0_9] : memref<240x32xf32, #tpu.memory_space<vmem>>, vector<1x32xf32>
    %cst_10 = arith.constant dense<0.000000e+00> : vector<4x32xf32>
    %41 = tpu.matmul %38, %39, %cst_10 {dimension_numbers = #tpu.dot_dimension_numbers<[1], [0], [0], [1], [0, 0, 1, 1], [], []>} : vector<4x32xf32>, vector<32x32xf32>, vector<4x32xf32> -> vector<4x32xf32>
    %42 = vector.broadcast %40 : vector<1x32xf32> to vector<4x32xf32>
    %43 = arith.addf %41, %42 : vector<4x32xf32>
    %44 = math.tanh %43 : vector<4x32xf32>
    %c104 = arith.constant 104 : index
    %c0_11 = arith.constant 0 : index
    %45 = vector.load %arg1[%c104, %c0_11] : memref<240x32xf32, #tpu.memory_space<vmem>>, vector<32x5xf32>
    %c233 = arith.constant 233 : index
    %c0_12 = arith.constant 0 : index
    %46 = vector.load %arg1[%c233, %c0_12] : memref<240x32xf32, #tpu.memory_space<vmem>>, vector<1x5xf32>
    %cst_13 = arith.constant dense<0.000000e+00> : vector<4x5xf32>
    %47 = tpu.matmul %44, %45, %cst_13 {dimension_numbers = #tpu.dot_dimension_numbers<[1], [0], [0], [1], [0, 0, 1, 1], [], []>} : vector<4x32xf32>, vector<32x5xf32>, vector<4x5xf32> -> vector<4x5xf32>
    %48 = vector.broadcast %46 : vector<1x5xf32> to vector<4x5xf32>
    %49 = arith.addf %47, %48 : vector<4x5xf32>
    %50 = vector.extract_strided_slice %44 {offsets = [0, 0], sizes = [2, 32], strides = [1, 1]} : vector<4x32xf32> to vector<2x32xf32>
    %51 = vector.extract_strided_slice %44 {offsets = [2, 0], sizes = [2, 32], strides = [1, 1]} : vector<4x32xf32> to vector<2x32xf32>
    %52 = arith.subf %50, %51 : vector<2x32xf32>
    %53 = math.absf %52 : vector<2x32xf32>
    %54 = tpu.concatenate %50, %51, %53 in 1 : vector<2x32xf32>, vector<2x32xf32>, vector<2x32xf32> -> vector<2x96xf32>
    %c136 = arith.constant 136 : index
    %c0_14 = arith.constant 0 : index
    %55 = vector.load %arg1[%c136, %c0_14] : memref<240x32xf32, #tpu.memory_space<vmem>>, vector<96x5xf32>
    %c234 = arith.constant 234 : index
    %c0_15 = arith.constant 0 : index
    %56 = vector.load %arg1[%c234, %c0_15] : memref<240x32xf32, #tpu.memory_space<vmem>>, vector<1x5xf32>
    %cst_16 = arith.constant dense<0.000000e+00> : vector<2x5xf32>
    %57 = tpu.matmul %54, %55, %cst_16 {dimension_numbers = #tpu.dot_dimension_numbers<[1], [0], [0], [1], [0, 0, 1, 1], [], []>} : vector<2x96xf32>, vector<96x5xf32>, vector<2x5xf32> -> vector<2x5xf32>
    %58 = vector.broadcast %56 : vector<1x5xf32> to vector<2x5xf32>
    %59 = arith.addf %57, %58 : vector<2x5xf32>
    %cst_17 = arith.constant 0.000000e+00 : f32
    %60 = vector.broadcast %cst_17 : f32 to vector<4x91xf32>
    %61 = tpu.concatenate %44, %49, %60 in 1 : vector<4x32xf32>, vector<4x5xf32>, vector<4x91xf32> -> vector<4x128xf32>
    %cst_18 = arith.constant 0.000000e+00 : f32
    %62 = vector.broadcast %cst_18 : f32 to vector<2x123xf32>
    %63 = tpu.concatenate %59, %62 in 1 : vector<2x5xf32>, vector<2x123xf32> -> vector<2x128xf32>
    %cst_19 = arith.constant 0.000000e+00 : f32
    %64 = vector.broadcast %cst_19 : f32 to vector<2x128xf32>
    %65 = tpu.concatenate %61, %63, %64 in 0 : vector<4x128xf32>, vector<2x128xf32>, vector<2x128xf32> -> vector<8x128xf32>
    %c0_20 = arith.constant 0 : index
    %c0_21 = arith.constant 0 : index
    %66 = vector.load %arg2[%c0_20, %c0_21] : memref<8x128xf32, #tpu.memory_space<vmem>>, vector<8x128xf32>
    tpu.vector_store %arg2[%c0_20, %c0_21], %65 {strides = array<i32>} : memref<8x128xf32, #tpu.memory_space<vmem>>, vector<8x128xf32>,
    return
  }
}

</mosaic_0001>

<bundles_post_ra>
// kernel: dual_model_forward.1
= control target key start
LH: loop header
LB: loop body
LE: loop exit
PB: predicated region body
PF: predicated region fallthrough
CT: control target
= control target key end

     0   :  { %v828_v0 = vmov 1   ;;  %v829_v2 = vmov 2   ;;  %v830_v10 = vmov 0   ;;  %s831_s17 = smov 64   ;;  %v19_v13 = vlaneseq  ;;  %s836_s21 = smov 32   ;;  %s1033_s0 = inlined_call_operand.vmem [shape: s32[32,3], index: 0, kind: input, shape index: {}]   ;;  %s1034_s1 = inlined_call_operand.vmem [shape: f32[240,32], index: 1, kind: input, shape index: {}]   ;;  %s1035_s2 = inlined_call_operand.vmem [shape: f32[8,128], index: 2, kind: output, shape index: {}]  }
   0x1   :  { %796 = vset.pattern.permute.xlu0 %v828_v0  ;;  %v11_v1 = vld [vmem:[%s1033_s0] sm:$0xff]  ;;  %797 = vset.pattern.permute.xlu1 %v829_v2  ;;  %v12_v3 = vld [vmem:[%s1033_s0 + $0x8] sm:$0xff]  ;;  %v13_v6 = vld [vmem:[%s1033_s0 + $0x10] sm:$0xff]  ;;  %v832_v15 = vmov 0.0|0.0   ;;  %v833_v18 = vmov 0.0   ;;  %vm834_vm4 = vmmov 0  }
   0x2   :  { %70 = vperm.xlu0 %796, %v11_v1   ;;  %v15_v4 = vcvt.s32.f32 %v11_v1  ;;  %v16_v5 = vcvt.s32.f32 %v12_v3  ;;  %v14_v7 = vld [vmem:[%s1033_s0 + $0x18] sm:$0xff]  ;;  %v17_v8 = vcvt.s32.f32 %v13_v6  ;;  %v867_v14 = vand.u32 127, %v19_v13  ;;  %739 = vmatprep.subr.bf16.mxu0 %v832_v15  ;;  %v218_v35 = vld [vmem:[%s1034_s1] sm:$0xff]  ;;  %v219_v36 = vld [vmem:[%s1034_s1 + $0x8] sm:$0xff] }
   0x3   :  { %v18_v9 = vcvt.s32.f32 %v14_v7  ;;  %745 = vmatprep.subr.bf16.mxu1 %v832_v15  ;;  %666 = vmatprep.mubr.msk.f32.mxu0 %vm834_vm4, %v833_v18  ;;  %v220_v37 = vld [vmem:[%s1034_s1 + $0x10] sm:$0xff]  ;;  %v746_v39 = vpack.c.bf16 %v219_v36, %v218_v35  ;;  %v221_v40 = vld [vmem:[%s1034_s1 + $0x18] sm:$0xff]  ;;  %v222_v45 = vld [vmem:[%s1034_s1 + $0x20] sm:$0xff]  ;;  %v136_v60 = vshrl.u32 %v19_v13, 7  ;;  %vm125_vm9 = vcmask 523264  }
   0x4   :  { %47 = vperm.xlu1 %797, %v15_v4   ;;  %v803_v11 = vpack.i.bf16 %v16_v5, %v15_v4  ;;  %687 = vmatprep.mubr.msk.f32.mxu1 %vm834_vm4, %v833_v18  ;;  %v749_v44 = vpack.c.bf16 %v221_v40, %v220_v37  ;;  %v223_v46 = vld [vmem:[%s1034_s1 + $0x28] sm:$0xff]  ;;  %v224_v51 = vld [vmem:[%s1034_s1 + $0x30] sm:$0xff]  ;;  %v225_v52 = vld [vmem:[%s1034_s1 + $0x38] sm:$0xff]  ;;  %vm130_vm10 = vcmask 539648   ;;  %vm144_vm14 = vcmask 261120  }
   0x5   :  { %v818_v12 = vpack.i.bf16 %v18_v9, %v17_v8  ;;  %747 = vmatpush3.bf16.msra.mxu1 %v746_v39  ;;  %v752_v50 = vpack.c.bf16 %v223_v46, %v222_v45  ;;  %v755_v56 = vpack.c.bf16 %v225_v52, %v224_v51  ;;  %v137_v4 = vmul.u32 8, %v136_v60  ;;  %v395_v39 = vld [vmem:[%s1034_s1 + $0x68] sm:$0xff]  ;;  %v396_v40 = vld [vmem:[%s1034_s1 + $0x70] sm:$0xff]  ;;  %v492_v46 = vld [vmem:[%s1034_s1 + $0x98] sm:$0xff] }
   0x6   :  { %73 = vperm.xlu0 %796, %v12_v3   ;;  %748 = vmatprep.subr.bf16.mxu1 %v832_v15  ;;  %vm230_vm15 = vcmask 1041408   ;;  %v491_v45 = vld [vmem:[%s1034_s1 + $0x90] sm:$0xff] }
   0x7   :  { %vm138_vm11 = vcmp.ge.s32.totalorder %v867_v14, %v137_v4  ;;  %v495_v51 = vld [vmem:[%s1034_s1 + $0xb0] sm:$0xff] }
   0x8   :  { %52 = vperm.xlu1 %797, %v16_v5  }
   0x9   :  { %750 = vmatpush3.bf16.msra.mxu1 %v749_v44 }
   0xa   :  { %76 = vperm.xlu0 %796, %v13_v6   ;;  %751 = vmatprep.subr.bf16.mxu1 %v832_v15 }
   0xc   :  { %798 = vset.pattern.permute.xlu1 %v828_v0 }
   0xd   :  { %79 = vperm.xlu1 %798, %v14_v7   ;;  %753 = vmatpush3.bf16.msra.mxu1 %v752_v50  ;;  %v494_v50 = vld [vmem:[%s1034_s1 + $0xa8] sm:$0xff] }
   0xe   :  { %799 = vset.pattern.permute.xlu0 %v829_v2  ;;  %754 = vmatprep.subr.bf16.mxu1 %v832_v15  ;;  %v776_v52 = vpack.c.bf16 %v495_v51, %v494_v50 }
   0xf   :  { %57 = vperm.xlu0 %799, %v17_v8  }
  0x11   :  { %800 = vset.pattern.permute.xlu1 %v829_v2  ;;  %756 = vmatpush3.bf16.msra.mxu1 %v755_v56  ;;  %v498_v56 = vld [vmem:[%s1034_s1 + $0xc8] sm:$0xff] }
  0x12   :  { %62 = vperm.xlu1 %800, %v18_v9   ;;  %685 = vmatprep.subr.mxu1 %v833_v18  ;;  %v139_v9 = vadd.s32 8, %v137_v4 }
  0x13   :  { %802 = vset.pattern.permute.xlu0 %v830_v10 }
  0x14   :  { %25 = vperm.xlu0 %802, %v12_v3   ;;  %vm140_vm12 = vcmp.lt.s32.totalorder %v867_v14, %v139_v9  ;;  %v616_v9 = vld [vmem:[%s1034_s1 + $0xe9] ss:$0 sm:$0xff] }
  0x15   :  { %vm141_vm13 = vmand %vm138_vm11, %vm140_vm12 }
  0x16   :  { %801 = vset.pattern.permute.xlu1 %v830_v10 }
  0x17   :  { %22 = vperm.xlu1 %801, %v11_v1  }
  0x1b   :  { %28 = vperm.xlu1 %801, %v13_v6  }
  0x1f   :  { %31 = vperm.xlu1 %801, %v14_v7  }
  0x23   :  { %804 = vrot.lane.b32.xlu1 %v803_v11, %s831_s17 }
  0x27   :  { %819 = vrot.lane.b32.xlu1 %v818_v12, %s831_s17 }
  0x81   :  { %v71_v16 = vpop.permute.xlu0 %70 }
  0x82   :  { %vm81_vm0 = vcmp.eq.s32.totalorder %v71_v16, %v867_v14 }
  0x83   :  { %v48_v17 = vpop.permute.xlu1 %47  ;;  %v606_v19 = vsel %vm81_vm0, 1.0, %v833_v18  ;;  %vm507_vm0 = vcmask 785408  }
  0x84   :  { %v93_v23 = vmul.f32 %v606_v19, %v48_v17 }
  0x85   :  { %v74_v20 = vpop.permute.xlu0 %73 }
  0x86   :  { %vm82_vm1 = vcmp.eq.s32.totalorder %v74_v20, %v867_v14 }
  0x87   :  { %v607_v21 = vsel %vm82_vm1, 1.0, %v833_v18  ;;  %v53_v22 = vpop.permute.xlu1 %52  ;;  %vm588_vm1 = vcmask 39936  }
  0x88   :  { %v94_v24 = vmul.f32 %v607_v21, %v53_v22 }
  0x89   :  { %v77_v25 = vpop.permute.xlu0 %76 }
  0x8a   :  { %v808_v26 = vpack.i.bf16 %v94_v24, %v93_v23  ;;  %vm83_vm2 = vcmp.eq.s32.totalorder %v77_v25, %v867_v14  ;;  %v610_v23 = vsel %vm141_vm13, 1.0, %v833_v18  ;;  %v835_v24 = vmov 66  }
  0x8b   :  { %v608_v29 = vsel %vm83_vm2, 1.0, %v833_v18  ;;  %823 = vset.pattern.permute.xlu0 %v835_v24  ;;  %vm586_vm2 = vcmask 302080  }
  0x8c   :  { %809 = vrot.lane.b32.xlu0 %v808_v26, %s831_s17  ;;  %v80_v27 = vpop.permute.xlu1 %79 }
  0x8d   :  { %vm84_vm3 = vcmp.eq.s32.totalorder %v80_v27, %v867_v14 }
  0x8e   :  { %v58_v28 = vpop.permute.xlu0 %57  ;;  %v609_v30 = vsel %vm84_vm3, 1.0, %v833_v18  ;;  %vm593_vm3 = vcmask 1043456  }
  0x8f   :  { %v95_v32 = vmul.f32 %v608_v29, %v58_v28  ;;  %v313_v29 = vld [vmem:[%s1034_s1 + $0x50] sm:$0xff] }
  0x91   :  { %v63_v31 = vpop.permute.xlu1 %62 }
  0x92   :  { %v96_v33 = vmul.f32 %v609_v30, %v63_v31 }
  0x93   :  { %v26_v34 = vpop.permute.xlu0 %25 }
  0x94   :  { %v813_v38 = vpack.i.bf16 %v96_v33, %v95_v32  ;;  %vm34_vm5 = vcmp.eq.s32.totalorder %v26_v34, %v867_v14  ;;  %v315_v32 = vld [vmem:[%s1034_s1 + $0x60] sm:$0xff] }
  0x95   :  { %v603_v41 = vsel %vm34_vm5, 1.0, %v833_v18 }
  0x96   :  { %v66_v42 = vmul.f32 %v603_v41, %v53_v22  ;;  %814 = vrot.lane.b32.xlu0 %v813_v38, %s831_s17  ;;  %v23_v43 = vpop.permute.xlu1 %22  ;;  %v397_v41 = vld [vmem:[%s1034_s1 + $0x78] sm:$0xff] }
  0x97   :  { %vm33_vm6 = vcmp.eq.s32.totalorder %v23_v43, %v867_v14  ;;  %v398_v43 = vld [vmem:[%s1034_s1 + $0x80] sm:$0xff] }
  0x98   :  { %v602_v47 = vsel %vm33_vm6, 1.0, %v833_v18  ;;  %v767_v44 = vpack.c.bf16 %v398_v43, %v397_v41 }
  0x99   :  { %v65_v48 = vmul.f32 %v602_v47, %v48_v17 }
  0x9a   :  { %v29_v49 = vpop.permute.xlu1 %28 }
  0x9b   :  { %vm35_vm7 = vcmp.eq.s32.totalorder %v29_v49, %v867_v14 }
  0x9c   :  { %v604_v53 = vsel %vm35_vm7, 1.0, %v833_v18 }
  0x9d   :  { %v67_v54 = vmul.f32 %v604_v53, %v58_v28  ;;  %v312_v28 = vld [vmem:[%s1034_s1 + $0x48] sm:$0xff]  ;;  %v496_v53 = vld [vmem:[%s1034_s1 + $0xb8] sm:$0xff] }
  0x9e   :  { %v32_v55 = vpop.permute.xlu1 %31  ;;  %v758_v30 = vpack.c.bf16 %v313_v29, %v312_v28 }
  0x9f   :  { %vm36_vm8 = vcmp.eq.s32.totalorder %v32_v55, %v867_v14  ;;  %v226_v14 = vld [vmem:[%s1034_s1 + $0x40] sm:$0x3] }
  0xa0   :  { %v605_v57 = vsel %vm36_vm8, 1.0, %v833_v18  ;;  %686 = vmatpush3.msk.msra.mxu1 %vm230_vm15, %v226_v14 }
  0xa1   :  { %v68_v58 = vmul.f32 %v605_v57, %v63_v31  ;;  %769 = vmatprep.subr.bf16.mxu1 %v832_v15  ;;  %v314_v31 = vld [vmem:[%s1034_s1 + $0x58] sm:$0xff]  ;;  %v499_v57 = vld [vmem:[%s1034_s1 + $0xd0] sm:$0xff] }
  0xa2   :  { %v805_v59 = vpop.permute.xlu1 %804  ;;  %v761_v33 = vpack.c.bf16 %v315_v32, %v314_v31 }
  0xa3   :  { %v807_v62 = vunpack.i.h.bf16 %v805_v59  ;;  %v806_v63 = vunpack.i.l.bf16 %v805_v59  ;;  %v614_v59 = vld [vmem:[%s1034_s1 + $0xe8] ss:$0 sm:$0xff] }
  0xa6   :  { %v820_v8 = vpop.permute.xlu1 %819 }
  0xa7   :  { %v822_v11 = vunpack.i.h.bf16 %v820_v8  ;;  %v821_v12 = vunpack.i.l.bf16 %v820_v8 }
  0xfe   :  { %v810_v61 = vpop.permute.xlu0 %809 }
  0xff   :  { %v812_v0 = vunpack.i.h.bf16 %v810_v61  ;;  %v811_v1 = vunpack.i.l.bf16 %v810_v61 }
 0x101   :  { %v126_v2 = vsel %vm125_vm9, %v65_v48, %v811_v1  ;;  %v127_v3 = vsel %vm125_vm9, %v66_v42, %v812_v0  ;;  %v764_v42 = vpack.c.bf16 %v396_v40, %v395_v39  ;;  %v493_v48 = vld [vmem:[%s1034_s1 + $0xa0] sm:$0xff] }
 0x102   :  { %v131_v5 = vsel %vm130_vm10, %v126_v2, %v806_v63  ;;  %v132_v6 = vsel %vm130_vm10, %v127_v3, %v807_v62  ;;  %v773_v49 = vpack.c.bf16 %v493_v48, %v492_v46  ;;  %v500_v63 = vld [vmem:[%s1034_s1 + $0xd8] sm:$0xff]  ;;  %v501_v0 = vld [vmem:[%s1034_s1 + $0xe0] sm:$0xff] }
 0x103   :  { %v740_v7 = vpack.c.bf16 %v132_v6, %v131_v5  ;;  %v785_v1 = vpack.c.bf16 %v501_v0, %v500_v63 }
 0x105   :  { %741 = vmatpush3.bf16.msra.mxu0 %v740_v7 }
 0x106   :  { %742 = vmatprep.subr.bf16.mxu0 %v832_v15 }
 0x108   :  { %v815_v10 = vpop.permute.xlu0 %814 }
 0x109   :  { %v817_v13 = vunpack.i.h.bf16 %v815_v10  ;;  %v816_v16 = vunpack.i.l.bf16 %v815_v10 }
 0x10b   :  { %v128_v17 = vsel %vm125_vm9, %v67_v54, %v816_v16  ;;  %v129_v19 = vsel %vm125_vm9, %v68_v58, %v817_v13  ;;  %v497_v54 = vld [vmem:[%s1034_s1 + $0xc0] sm:$0xff]  ;;  %v782_v58 = vpack.c.bf16 %v499_v57, %v498_v56  ;;  %v618_v13 = vld [vmem:[%s1034_s1 + $0xea] ss:$0 sm:$0xff] }
 0x10c   :  { %v133_v20 = vsel %vm130_vm10, %v128_v17, %v821_v12  ;;  %v134_v21 = vsel %vm130_vm10, %v129_v19, %v822_v11  ;;  %v779_v55 = vpack.c.bf16 %v497_v54, %v496_v53 }
 0x10d   :  { %v743_v22 = vpack.c.bf16 %v134_v21, %v133_v20 }
 0x10f   :  { %744 = vmatpush3.bf16.msra.mxu0 %v743_v22 }
 0x110   :  { %757 = vmatprep.subr.bf16.mxu0 %v832_v15 }
 0x112   :  { %667 = vmatmul.mubr.msk.f32.vlgmr.msra.gmra.mrb[0].mxu0 %vm144_vm14, %v610_v23 }
 0x113   :  { %698 = vmatprep.mubr.msk.f32.mxu0 %vm834_vm4, %v833_v18  ;;  %759 = vmatpush3.bf16.msra.mxu0 %v758_v30 }
 0x114   :  { %760 = vmatprep.subr.bf16.mxu0 %v832_v15 }
 0x117   :  { %762 = vmatpush3.bf16.msra.mxu0 %v761_v33 }
 0x118   :  { %763 = vmatprep.subr.bf16.mxu0 %v832_v15 }
 0x1e5   :  { %v214_v25 = vpop.f32.mrb[0].mxu0 }
 0x1e6   :  { %v304_v26 = vmax.f32 %v214_v25, 1.0  ;;  %v668_v27 = vpop.f32.mrb[1].mxu0  ;;  %688 = vmatmul.mubr.msk.f32.vlgmr.msra.gmra.mrb[0].mxu1 %vm130_vm10, %v214_v25 }
 0x1e7   :  { %736 = vmatprep.mubr.msk.f32.mxu1 %vm834_vm4, %v833_v18 }
 0x1e8   :  { %307 = vperm.xlu0 %823, %v304_v26  }
 0x267   :  { %v308_v34 = vpop.permute.xlu0 %307 }
 0x268   :  { %824 = vrcp.f32 %v308_v34 }
 0x272   :  { %v825_v35 = vpop.eup %824 }
 0x2b9   :  { %v300_v36 = vpop.f32.mrb[0].mxu1 }
 0x2ba   :  { %v311_v37 = vmul.f32 %v825_v35, %v300_v36  ;;  %v689_v38 = vpop.f32.mrb[1].mxu1 }
 0x2bc   :  { %699 = vmatmul.mubr.msk.f32.vlgmr.msra.gmra.mrb[2].mxu0 %vm144_vm14, %v311_v37 }
 0x2bd   :  { %709 = vmatprep.mubr.msk.f32.mxu0 %vm834_vm4, %v833_v18  ;;  %765 = vmatpush3.bf16.msra.mxu0 %v764_v42  ;;  %v490_v18 = vld [vmem:[%s1034_s1 + $0x88] sm:$0xff]  ;;  %vm595_vm4 = vcmask 1045504  }
 0x2be   :  { %766 = vmatprep.subr.bf16.mxu0 %v832_v15  ;;  %v770_v47 = vpack.c.bf16 %v491_v45, %v490_v18 }
 0x2c0   :  { %771 = vmatpush3.bf16.msra.mxu1 %v770_v47 }
 0x2c1   :  { %768 = vmatpush3.bf16.msra.mxu0 %v767_v44  ;;  %772 = vmatprep.subr.bf16.mxu1 %v832_v15 }
 0x2c4   :  { %774 = vmatpush3.bf16.msra.mxu1 %v773_v49 }
 0x2c5   :  { %775 = vmatprep.subr.bf16.mxu1 %v832_v15 }
 0x2c8   :  { %777 = vmatpush3.bf16.msra.mxu1 %v776_v52 }
 0x2c9   :  { %778 = vmatprep.subr.bf16.mxu1 %v832_v15 }
 0x2cc   :  { %780 = vmatpush3.bf16.msra.mxu1 %v779_v55 }
 0x2cd   :  { %781 = vmatprep.subr.bf16.mxu1 %v832_v15 }
 0x2d0   :  { %783 = vmatpush3.bf16.msra.mxu1 %v782_v58 }
 0x2d1   :  { %784 = vmatprep.subr.bf16.mxu1 %v832_v15 }
 0x2d4   :  { %786 = vmatpush3.bf16.msra.mxu1 %v785_v1 }
 0x38f   :  { %v390_v60 = vpop.f32.mrb[2].mxu0 }
 0x390   :  { %v391_v61 = vadd.f32 %v614_v59, %v390_v60  ;;  %v700_v62 = vpop.f32.mrb[3].mxu0 }
 0x392   :  { %826 = vtanh.f32 %v391_v61 }
 0x39c   :  { %v827_v2 = vpop.eup %826 }
 0x39d   :  { %710 = vmatmul.mubr.msk.f32.vlgmr.msra.gmra.mrb[4].mxu0 %vm144_vm14, %v827_v2  ;;  %v477_v15 = vrot.slane %v827_v2, 2 }
 0x39f   :  { %481 = vrot.lane.b32.xlu1 %v477_v15, %s836_s21  ;;  %v479_v3 = vsub.f32 %v827_v2, %v477_v15 }
 0x3a1   :  { %v480_v4 = vand.u32 2147483647, %v479_v3 }
 0x3a3   :  { %485 = vrot.lane.b32.xlu1 %v480_v4, %s831_s17 }
 0x411   :  { %v482_v5 = vpop.permute.xlu1 %481 }
 0x412   :  { %v488_v6 = vsel %vm144_vm14, %v827_v2, %v482_v5 }
 0x415   :  { %v486_v7 = vpop.permute.xlu1 %485 }
 0x416   :  { %v489_v8 = vsel %vm125_vm9, %v488_v6, %v486_v7 }
 0x417   :  { %737 = vmatmul.mubr.msk.f32.vlgmr.msra.gmra.mrb[2].mxu1 %vm507_vm0, %v489_v8 }
 0x470   :  { %v473_v10 = vpop.f32.mrb[4].mxu0 }
 0x471   :  { %v474_v11 = vadd.f32 %v616_v9, %v473_v10  ;;  %v711_v12 = vpop.f32.mrb[5].mxu0 }
 0x473   :  { %582 = vrot.lane.b32.xlu0 %v474_v11, %s836_s21 }
 0x4e5   :  { %v583_v16 = vpop.permute.xlu0 %582 }
 0x4e6   :  { %v585_v21 = vsel %vm144_vm14, %v827_v2, %v583_v16 }
 0x4e7   :  { %v587_v14 = vsel %vm586_vm2, %v585_v21, 0.0 }
 0x4ea   :  { %v577_v17 = vpop.f32.mrb[2].mxu1 }
 0x4eb   :  { %v578_v19 = vadd.f32 %v618_v13, %v577_v17  ;;  %v738_v20 = vpop.f32.mrb[3].mxu1 }
 0x4ed   :  { %v589_v22 = vsel %vm588_vm1, %v578_v19, 0.0 }
 0x4ee   :  { %v591_v23 = vrot.slane %v589_v22, 4 }
 0x4f0   :  { %v594_v24 = vsel %vm593_vm3, %v587_v14, %v591_v23 }
 0x4f1   :  { %v596_v25 = vsel %vm595_vm4, %v594_v24, 0.0 }
 0x4f2   :  { %597 = vst [vmem:[%s1035_s2] sm:$0xff] %v596_v25 }

</bundles_post_ra>
